<compile_context>
chip_gen: v6e
topology: v6e:2x2x1
jax: 0.10.0
libtpu: 0.0.40
codegen_flags: <defaults>
</compile_context>

<pallas_src>
import functools

import jax
import jax.numpy as jnp
from jax import lax
from jax.experimental import pallas as pl
from jax.experimental.pallas import tpu as pltpu

_EPS = 1e-12          # torch F.normalize default eps (clamps the L2 norm)
_EPS2 = _EPS * _EPS   # clamp on squared norms: sqrt(max(s, eps^2)) == max(||.||, eps)
_LANES = 128
_TARGET_TILE_BYTES = 2 << 20   # ~2 MiB of each input per grid step (HBM roofline plateau)


def _cdiv(a, b):
    return (a + b - 1) // b


def _round_up(a, b):
    return _cdiv(a, b) * b


def _device_kind():
    try:
        return jax.devices()[0].device_kind.lower()
    except Exception:
        return ""


def _num_tensorcores():
    # v7x packs 2 TensorCores per chip; v5e/v6e have 1.
    return 2 if "v7" in _device_kind() else 1


def _has_native_bf16_vpu():
    # v6e/v7x VPUs execute bf16 natively; v5e and older do not.
    k = _device_kind()
    return ("v6" in k) or ("v7" in k)


def _vmem_limit_bytes():
    """Modest scoped-VMEM request: real usage with ~2 MiB streaming tiles is
    well under 20 MiB, so keep headroom for compiler scratch (esp. v7x)."""
    try:
        phys = int(pltpu.get_tpu_info().vmem_capacity_bytes)
    except Exception:
        phys = 64 << 20   # conservative (v7x-sized) fallback
    return max(16 << 20, min(32 << 20, phys // 2))


def _vmem_usage_bytes(block_b, D, itemsize, keep_bf16):
    """Conservative per-step VMEM estimate (review fix: count the f32 cast
    copies, the f32 product intermediates and the output double-buffers)."""
    compute_item = itemsize if keep_bf16 else 4
    in_tiles = 2 * 2 * block_b * D * itemsize            # 2 inputs x double buffer
    casts = 0 if compute_item == itemsize else 2 * block_b * D * 4
    prods = 3 * block_b * D * compute_item               # x*x, x*y, y*y live values
    out_tiles = 2 * _round_up(block_b, _LANES) * 4       # lane-dense (1,1,block_b) x 2
    epilogue = 2 * _LANES * _LANES * 4                   # diagonal-scatter scratch
    return in_tiles + casts + prods + out_tiles + epilogue


def _pick_block_b(B, D, itemsize, keep_bf16, vmem_limit):
    """Rows per grid step: capped streaming tile, >=2 steps/core on v7x."""
    sublane = max(8, 32 // itemsize)   # min sublane tile: 8 (f32), 16 (bf16), 32 (int8)
    if B < sublane:
        return B                       # single full-array block (equals array dim)
    # (1) streaming cap: ~2 MiB of each input per step already sits at the HBM
    #     roofline; bigger tiles only shrink the grid and add VMEM pressure.
    bb = max(sublane, (_TARGET_TILE_BYTES // max(1, D * itemsize)) // sublane * sublane)
    # (2) multi-TensorCore parts (v7x): guarantee >= 2 grid steps per core so
    #     each core's input DMA has something to overlap with.  On 1-TC chips
    #     (v5e/v6e) no forced split: small batches stay a single grid step.
    cores = _num_tensorcores()
    if cores > 1:
        per_step = _round_up(_cdiv(B, 2 * cores), sublane)
        bb = max(sublane, min(bb, per_step))
    # (3) never bigger than the (sublane-padded) batch.
    bb = min(bb, _round_up(B, sublane))
    # (4) honest VMEM accounting; stay well under the scoped limit.
    while bb > sublane and _vmem_usage_bytes(bb, D, itemsize, keep_bf16) > vmem_limit * 3 // 5:
        bb = max(sublane, _round_up(bb // 2, sublane))
    return bb


def _byol_loss_kernel(x_ref, y_ref, o_ref, *, use_mxu, keep_bf16):
    x = x_ref[...]
    y = y_ref[...]
    if not keep_bf16:
        # v5e has no bf16 VPU (and f32 inputs are already f32): compute in f32.
        x = x.astype(jnp.float32)
        y = y.astype(jnp.float32)
    bb, d = x.shape

    xx = x * x
    xy = x * y
    yy = y * y

    if use_mxu:
        # Fused MXU reduction: one RHS push, one (3*bb, d) @ (d, 1) matmul,
        # f32 accumulation.  Used for small D (XLU would bind) and for native
        # bf16 inputs (bf16 LHS, f32 accumulate).
        ones = jnp.ones((d, 1), x.dtype)
        s = jnp.dot(jnp.concatenate([xx, xy, yy], axis=0), ones,
                    preferred_element_type=jnp.float32)        # (3*bb, 1)
        sxx = s[0:bb, :]
        sxy = s[bb:2 * bb, :]
        syy = s[2 * bb:3 * bb, :]
    else:
        # HBM-bound regime (D >= ~256): VPU partial sums + XLU cross-lane
        # reduce are wall-time free and bit-closer to the f32 reference.
        sxx = jnp.sum(xx, axis=-1, keepdims=True)
        sxy = jnp.sum(xy, axis=-1, keepdims=True)
        syy = jnp.sum(yy, axis=-1, keepdims=True)

    # Fused normalization: one EUP rsqrt on the squared norms.
    denom = jnp.maximum(sxx, _EPS2) * jnp.maximum(syy, _EPS2)
    loss = 2.0 - 2.0 * (sxy * lax.rsqrt(denom))                # (bb, 1) f32

    # Lane-dense epilogue: move the per-row column into the (1, 1, block_b)
    # output row, 128 lanes at a time.  Uses only broadcast / iota / where /
    # sublane-sum + static slice stores (no transpose/reshape relayout).
    for c0 in range(0, bb, _LANES):
        w = min(_LANES, bb - c0)
        col = loss[c0:c0 + w, :]                               # (w, 1)
        rows = lax.broadcasted_iota(jnp.int32, (w, w), 0)
        cols = lax.broadcasted_iota(jnp.int32, (w, w), 1)
        row = jnp.sum(jnp.where(rows == cols, col, 0.0),
                      axis=0, keepdims=True)                   # (1, w)
        o_ref[:, :, c0:c0 + w] = row.reshape(1, 1, w).astype(o_ref.dtype)


def byol_loss(x, y, *, block_b=None, input_buffers=2):
    """x, y: (..., D) embeddings (same shape). Returns (...,) loss."""
    assert x.shape == y.shape, (x.shape, y.shape)
    out_dtype = jnp.result_type(x.dtype, y.dtype)
    lead = x.shape[:-1]
    D = x.shape[-1]
    x2 = x.reshape(-1, D)          # keep HBM dtype narrow; cast (if any) inside kernel
    y2 = y.reshape(-1, D)
    B = x2.shape[0]

    itemsize = max(jnp.dtype(x.dtype).itemsize, jnp.dtype(y.dtype).itemsize)
    keep_bf16 = (x.dtype == jnp.bfloat16 and y.dtype == jnp.bfloat16
                 and _has_native_bf16_vpu())
    vmem_limit = _vmem_limit_bytes()
    if block_b is None:
        block_b = _pick_block_b(B, D, itemsize, keep_bf16, vmem_limit)

    num_blocks = _cdiv(B, block_b)
    use_mxu = keep_bf16 or D <= 128

    kernel = functools.partial(_byol_loss_kernel, use_mxu=use_mxu, keep_bf16=keep_bf16)

    if input_buffers > 2:
        # Optional deeper input pipelining if profiling ever shows exposed DMA.
        in_spec = pl.BlockSpec((block_b, D), lambda i: (i, 0),
                               pipeline_mode=pl.Buffered(input_buffers))
    else:
        in_spec = pl.BlockSpec((block_b, D), lambda i: (i, 0))

    cost = pl.CostEstimate(
        flops=9 * B * D + 8 * B,                 # products + reductions + epilogue
        transcendentals=B,                       # one rsqrt per row
        bytes_accessed=2 * B * D * itemsize + B * 4,
    )

    out = pl.pallas_call(
        kernel,
        out_shape=jax.ShapeDtypeStruct((num_blocks, 1, block_b), jnp.float32),
        grid_spec=pltpu.PrefetchScalarGridSpec(
            num_scalar_prefetch=0,
            grid=(num_blocks,),
            in_specs=[in_spec, in_spec],
            out_specs=pl.BlockSpec((1, 1, block_b), lambda i: (i, 0, 0)),
        ),
        compiler_params=pltpu.CompilerParams(
            dimension_semantics=("parallel",),
            vmem_limit_bytes=vmem_limit,
        ),
        cost_estimate=cost,
    )(x2, y2)
    # Padded tail rows (ragged last block) are sliced away here.
    return out.reshape(-1)[:B].reshape(lead).astype(out_dtype)


def byol_loss_ref(x, y):
    """Pure-JAX reference mirroring the PyTorch forward (f32 throughout)."""
    xf = x.astype(jnp.float32)
    yf = y.astype(jnp.float32)
    xn = xf / jnp.maximum(jnp.linalg.norm(xf, axis=-1, keepdims=True), _EPS)
    yn = yf / jnp.maximum(jnp.linalg.norm(yf, axis=-1, keepdims=True), _EPS)
    return 2.0 - 2.0 * jnp.sum(xn * yn, axis=-1)


if __name__ == "__main__":
    key = jax.random.PRNGKey(0)
    kx, ky = jax.random.split(key)

    # BYOL-style projection embeddings: batch 64, projection dim 256.
    # D >= 256 exercises the VPU/XLU-sum reduction path.
    B, D = 64, 256
    x = jax.random.normal(kx, (B, D), dtype=jnp.float32)
    y = jax.random.normal(ky, (B, D), dtype=jnp.float32)
    loss = jax.block_until_ready(byol_loss(x, y))
    ref = byol_loss_ref(x, y)
    assert loss.shape == (B,)
    assert jnp.allclose(loss, ref, atol=5e-3, rtol=5e-3), (loss, ref)

    # Ragged batch + small D: exercises the fused-MXU reduction path and the
    # padded last tile / tail-slice path.
    B2, D2 = 20, 128
    x2 = jax.random.normal(kx, (B2, D2), dtype=jnp.float32)
    y2 = jax.random.normal(ky, (B2, D2), dtype=jnp.float32)
    loss2 = jax.block_until_ready(byol_loss(x2, y2))
    ref2 = byol_loss_ref(x2, y2)
    assert loss2.shape == (B2,)
    assert jnp.allclose(loss2, ref2, atol=5e-3, rtol=5e-3), (loss2, ref2)

    # Leading batch dims, as the module allows arbitrary (..., D).
    x3 = jax.random.normal(kx, (2, 4, 256), dtype=jnp.float32)
    y3 = jax.random.normal(ky, (2, 4, 256), dtype=jnp.float32)
    loss3 = jax.block_until_ready(byol_loss(x3, y3))
    ref3 = byol_loss_ref(x3, y3)
    assert loss3.shape == (2, 4)
    assert jnp.allclose(loss3, ref3, atol=5e-3, rtol=5e-3), (loss3, ref3)

    print("KERNEL_OK")
</pallas_src>

<mosaic_0001>
module attributes {stable_mosaic.version = 11 : i64} {
  func.func @_byol_loss_kernel(%arg0: i32, %arg1: memref<64x256xf32, #tpu.memory_space<vmem>>, %arg2: memref<64x256xf32, #tpu.memory_space<vmem>>, %arg3: memref<1x1x64xf32, #tpu.memory_space<vmem>>) attributes {dimension_semantics = [#tpu.dimension_semantics<parallel>], iteration_bounds = array<i64: 1>, scalar_prefetch = 0 : i64, scratch_operands = 0 : i64, tpu.core_type = #tpu.core_type<tc>, window_params = [{transform_indices = @transform_0, window_bounds = array<i64: 64, 256>}, {transform_indices = @transform_1, window_bounds = array<i64: 64, 256>}, {transform_indices = @transform_2, window_bounds = array<i64: 1, 1, 64>}]} {
    %c0 = arith.constant 0 : index
    %c0_0 = arith.constant 0 : index
    %0 = vector.load %arg1[%c0, %c0_0] : memref<64x256xf32, #tpu.memory_space<vmem>>, vector<64x256xf32>
    %c0_1 = arith.constant 0 : index
    %c0_2 = arith.constant 0 : index
    %1 = vector.load %arg2[%c0_1, %c0_2] : memref<64x256xf32, #tpu.memory_space<vmem>>, vector<64x256xf32>
    %2 = arith.mulf %0, %0 : vector<64x256xf32>
    %3 = arith.mulf %0, %1 : vector<64x256xf32>
    %4 = arith.mulf %1, %1 : vector<64x256xf32>
    %cst = arith.constant dense<0.000000e+00> : vector<64xf32>
    %5 = vector.multi_reduction <add>, %2, %cst [1] : vector<64x256xf32> to vector<64xf32>
    %6 = vector.shape_cast %5 : vector<64xf32> to vector<64x1xf32>
    %cst_3 = arith.constant dense<0.000000e+00> : vector<64xf32>
    %7 = vector.multi_reduction <add>, %3, %cst_3 [1] : vector<64x256xf32> to vector<64xf32>
    %8 = vector.shape_cast %7 : vector<64xf32> to vector<64x1xf32>
    %cst_4 = arith.constant dense<0.000000e+00> : vector<64xf32>
    %9 = vector.multi_reduction <add>, %4, %cst_4 [1] : vector<64x256xf32> to vector<64xf32>
    %10 = vector.shape_cast %9 : vector<64xf32> to vector<64x1xf32>
    %cst_5 = arith.constant 1.000000e-24 : f32
    %11 = vector.broadcast %cst_5 : f32 to vector<64x1xf32>
    %12 = arith.maximumf %6, %11 : vector<64x1xf32>
    %cst_6 = arith.constant 1.000000e-24 : f32
    %13 = vector.broadcast %cst_6 : f32 to vector<64x1xf32>
    %14 = arith.maximumf %10, %13 : vector<64x1xf32>
    %15 = arith.mulf %12, %14 : vector<64x1xf32>
    %16 = math.rsqrt %15 : vector<64x1xf32>
    %17 = arith.mulf %8, %16 : vector<64x1xf32>
    %cst_7 = arith.constant 2.000000e+00 : f32
    %18 = vector.broadcast %cst_7 : f32 to vector<64x1xf32>
    %19 = arith.mulf %18, %17 : vector<64x1xf32>
    %cst_8 = arith.constant 2.000000e+00 : f32
    %20 = vector.broadcast %cst_8 : f32 to vector<64x1xf32>
    %21 = arith.subf %20, %19 : vector<64x1xf32>
    %22 = tpu.iota {dimensions = array<i32: 0>} : vector<64x64xi32>
    %23 = tpu.iota {dimensions = array<i32: 1>} : vector<64x64xi32>
    %24 = arith.cmpi eq, %22, %23 : vector<64x64xi32>
    %cst_9 = arith.constant 0.000000e+00 : f32
    %25 = vector.shape_cast %21 : vector<64x1xf32> to vector<64x1xf32>
    %26 = vector.broadcast %25 : vector<64x1xf32> to vector<64x64xf32>
    %27 = vector.broadcast %cst_9 : f32 to vector<64x64xf32>
    %28 = arith.select %24, %26, %27 : vector<64x64xi1>, vector<64x64xf32>
    %cst_10 = arith.constant dense<0.000000e+00> : vector<64xf32>
    %29 = vector.multi_reduction <add>, %28, %cst_10 [0] : vector<64x64xf32> to vector<64xf32>
    %30 = vector.shape_cast %29 : vector<64xf32> to vector<1x64xf32>
    %31 = vector.shape_cast %30 : vector<1x64xf32> to vector<1x1x64xf32>
    %c0_11 = arith.constant 0 : index
    %c0_12 = arith.constant 0 : index
    %c0_13 = arith.constant 0 : index
    %32 = vector.load %arg3[%c0_11, %c0_12, %c0_13] : memref<1x1x64xf32, #tpu.memory_space<vmem>>, vector<1x1x64xf32>
    tpu.vector_store %arg3[%c0_11, %c0_12, %c0_13], %31 {strides = array<i32>} : memref<1x1x64xf32, #tpu.memory_space<vmem>>, vector<1x1x64xf32>,
    return
  }
  func.func @transform_0(%arg0: i32) -> (i32, i32) {
    %c0_i32 = arith.constant 0 : i32
    %c0_i32_0 = arith.constant 0 : i32
    return %arg0, %c0_i32 : i32, i32
  }
  func.func @transform_1(%arg0: i32) -> (i32, i32) {
    %c0_i32 = arith.constant 0 : i32
    %c0_i32_0 = arith.constant 0 : i32
    return %arg0, %c0_i32 : i32, i32
  }
  func.func @transform_2(%arg0: i32) -> (i32, i32, i32) {
    %c0_i32 = arith.constant 0 : i32
    %c0_i32_0 = arith.constant 0 : i32
    %c0_i32_1 = arith.constant 0 : i32
    return %arg0, %c0_i32, %c0_i32_0 : i32, i32, i32
  }
}

</mosaic_0001>

<bundles_post_ra>
// kernel: tpu_custom_call.1
= control target key start
LH: loop header
LB: loop body
LE: loop exit
PB: predicated region body
PF: predicated region fallthrough
CT: control target
= control target key end

     0   :  { %7 = vsyncpa [#allocation3], 0  ;;  %s565_s0 = inlined_call_operand.hbm [shape: f32[64,256], index: 0, kind: input, shape index: {}]   ;;  %s566_s1 = inlined_call_operand.hbm [shape: f32[64,256], index: 1, kind: input, shape index: {}]   ;;  %s567_s2 = inlined_call_operand.hbm [shape: f32[1,1,64], index: 2, kind: output, shape index: {}]  }
   0x1   :  { %8 = vsyncpa [#allocation6], 0 }
   0x2   :  { %9 = vsyncpa [#allocation4], 0  ;;  %s402_s9 = smov [#allocation2]  }
   0x3   :  { %s15_s10 = sshll.u32 %s402_s9, 4  ;;  %s16_s10 = int_to_ptr.vmem [resolvable:$true] %s15_s10 }
   0x4   :  { %s344_s11 = scalar_lea.vmem %s16_s10, 2048  ;;  %p349_p1 = scmp.lt.s32.totalorder %s16_s10, %s16_s10 }
   0x5   :  { %p345_p0 = scmp.ne.s32.totalorder %s16_s10, %s344_s11  ;;  %p350_p2 = scmp.lt.s32.totalorder %s344_s11, %s344_s11 }
   0x7   :  { %p351_p3 = por %p350_p2, %p349_p1 }
   0x9   :  { %p352_p4 = pnand %p351_p3, %p345_p0 }
   0xb   :  { %355 = shalt.err (!%p352_p4)
}
   0xc   :  { %s403_s12 = smov 256   ;;  %s404_s13 = smov 16  }
   0xd   :  { %21 = dma.hbm_to_vmem [thread:$0]  %s565_s0, 2048, %s16_s10, [#allocation3], %s403_s12, %s403_s12, %s404_s13  }
   0xe   :  { %s405_s16 = smov [#allocation5]  }
   0xf   :  { %s27_s17 = sshll.u32 %s405_s16, 4  ;;  %s28_s17 = int_to_ptr.vmem [resolvable:$true] %s27_s17 }
  0x10   :  { %s364_s18 = scalar_lea.vmem %s28_s17, 2048  ;;  %p369_p6 = scmp.lt.s32.totalorder %s28_s17, %s28_s17 }
  0x11   :  { %p365_p5 = scmp.ne.s32.totalorder %s28_s17, %s364_s18  ;;  %p370_p7 = scmp.lt.s32.totalorder %s364_s18, %s364_s18 }
  0x13   :  { %p371_p8 = por %p370_p7, %p369_p6 }
  0x15   :  { %p372_p9 = pnand %p371_p8, %p365_p5 }
  0x17   :  { %375 = shalt.err (!%p372_p9)
}
  0x18   :  { %33 = dma.hbm_to_vmem [thread:$0]  %s566_s1, 2048, %s28_s17, [#allocation6], %s403_s12, %s403_s12, %s404_s13  }
  0x19   :  { %396 = dma.done.wait [#allocation3], 2048  }
  0x1a   :  { %397 = vsyncadd [#allocation3], 4294965248 }
  0x1b   :  { %398 = dma.done.wait [#allocation6], 2048  }
  0x1c   :  { %399 = vsyncadd [#allocation6], 4294965248  ;;  %v428_v0 = vld [vmem:[#allocation5] sm:$0xff]  ;;  %v430_v1 = vld [vmem:[#allocation5 + $0x8] sm:$0xff]  ;;  %vm275_vm2 = vcmask 523264   ;;  %s406_s0 = smov [#allocation7]  }
  0x1d   :  { %v432_v2 = vld [vmem:[#allocation2] sm:$0xff]  ;;  %v104_v3 = vmul.f32 %v428_v0, %v428_v0  ;;  %v105_v4 = vmul.f32 %v430_v1, %v430_v1  ;;  %v438_v5 = vld [vmem:[#allocation2 + $0x8] sm:$0xff]  ;;  %v442_v7 = vld [vmem:[#allocation5 + $0x10] sm:$0xff]  ;;  %s305_s1 = sshll.u32 %s406_s0, 4  ;;  %vm297_vm9 = vcmask 516096   ;;  %s306_s1 = int_to_ptr.vmem [resolvable:$true] %s305_s1 }
  0x1e   :  { %v72_v6 = vmul.f32 %v432_v2, %v432_v2  ;;  %v444_v8 = vld [vmem:[#allocation5 + $0x18] sm:$0xff]  ;;  %v73_v9 = vmul.f32 %v438_v5, %v438_v5  ;;  %v106_v10 = vmul.f32 %v442_v7, %v442_v7  ;;  %v452_v12 = vld [vmem:[#allocation2 + $0x10] sm:$0xff]  ;;  %v456_v14 = vld [vmem:[#allocation5 + $0x20] sm:$0xff]  ;;  %s376_s21 = scalar_lea.vmem %s306_s1, 16  ;;  %s380_s22 = scalar_lea.vmem %s306_s1, 32 }
  0x1f   :  { %v107_v11 = vmul.f32 %v444_v8, %v444_v8  ;;  %v454_v13 = vld [vmem:[#allocation2 + $0x18] sm:$0xff]  ;;  %v168_v15 = vadd.f32 %v105_v4, %v104_v3  ;;  %v74_v16 = vmul.f32 %v452_v12, %v452_v12  ;;  %v462_v18 = vld [vmem:[#allocation5 + $0x28] sm:$0xff]  ;;  %v464_v19 = vld [vmem:[#allocation2 + $0x20] sm:$0xff]  ;;  %v108_v23 = vmul.f32 %v456_v14, %v456_v14  ;;  %p377_p10 = scmp.ne.s32.totalorder %s306_s1, %s376_s21  ;;  %p381_p11 = scmp.lt.s32.totalorder %s306_s1, %s306_s1 }
  0x20   :  { %v75_v17 = vmul.f32 %v454_v13, %v454_v13  ;;  %v466_v20 = vld [vmem:[#allocation2 + $0x28] sm:$0xff]  ;;  %v120_v21 = vadd.f32 %v73_v9, %v72_v6  ;;  %v109_v24 = vmul.f32 %v462_v18, %v462_v18  ;;  %v76_v26 = vmul.f32 %v464_v19, %v464_v19  ;;  %v476_v28 = vld [vmem:[#allocation5 + $0x30] sm:$0xff]  ;;  %v478_v29 = vld [vmem:[#allocation5 + $0x38] sm:$0xff]  ;;  %p382_p12 = scmp.lt.s32.totalorder %s380_s22, %s376_s21 }
  0x21   :  { %169 = vadd.xlane.f32.xlu1 %v168_v15  ;;  %v171_v22 = vadd.f32 %v107_v11, %v106_v10  ;;  %v77_v27 = vmul.f32 %v466_v20, %v466_v20  ;;  %v480_v30 = vld [vmem:[#allocation2 + $0x30] sm:$0xff]  ;;  %v482_v31 = vld [vmem:[#allocation2 + $0x38] sm:$0xff]  ;;  %v110_v33 = vmul.f32 %v476_v28, %v476_v28  ;;  %v111_v34 = vmul.f32 %v478_v29, %v478_v29  ;;  %v492_v38 = vld [vmem:[#allocation5 + $0x40] sm:$0xff] }
  0x22   :  { %121 = vadd.xlane.f32.xlu0 %v120_v21  ;;  %v123_v25 = vadd.f32 %v75_v17, %v74_v16  ;;  %v174_v32 = vadd.f32 %v109_v24, %v108_v23  ;;  %v78_v36 = vmul.f32 %v480_v30, %v480_v30  ;;  %v79_v37 = vmul.f32 %v482_v31, %v482_v31  ;;  %v494_v39 = vld [vmem:[#allocation5 + $0x48] sm:$0xff]  ;;  %v496_v40 = vld [vmem:[#allocation2 + $0x40] sm:$0xff]  ;;  %v66_v48 = vld [vmem:[#allocation5 + $0x50] sm:$0xff]  ;;  %p383_p13 = por %p382_p12, %p381_p11 }
  0x23   :  { %v126_v35 = vadd.f32 %v77_v27, %v76_v26  ;;  %v498_v41 = vld [vmem:[#allocation2 + $0x48] sm:$0xff]  ;;  %v177_v42 = vadd.f32 %v111_v34, %v110_v33  ;;  %v112_v43 = vmul.f32 %v492_v38, %v492_v38  ;;  %v113_v44 = vmul.f32 %v494_v39, %v494_v39  ;;  %v67_v49 = vld [vmem:[#allocation5 + $0x58] sm:$0xff]  ;;  %v50_v50 = vld [vmem:[#allocation2 + $0x50] sm:$0xff] }
  0x24   :  { %v129_v45 = vadd.f32 %v79_v37, %v78_v36  ;;  %v80_v46 = vmul.f32 %v496_v40, %v496_v40  ;;  %v81_v47 = vmul.f32 %v498_v41, %v498_v41  ;;  %v51_v51 = vld [vmem:[#allocation2 + $0x58] sm:$0xff]  ;;  %v114_v53 = vmul.f32 %v66_v48, %v66_v48  ;;  %v68_v58 = vld [vmem:[#allocation5 + $0x60] sm:$0xff]  ;;  %v69_v59 = vld [vmem:[#allocation5 + $0x68] sm:$0xff]  ;;  %p384_p0 = pnand %p383_p13, %p377_p10 }
  0x25   :  { %172 = vadd.xlane.f32.xlu1 %v171_v22  ;;  %v180_v52 = vadd.f32 %v113_v44, %v112_v43  ;;  %v115_v54 = vmul.f32 %v67_v49, %v67_v49  ;;  %v82_v56 = vmul.f32 %v50_v50, %v50_v50  ;;  %v83_v57 = vmul.f32 %v51_v51, %v51_v51  ;;  %v52_v60 = vld [vmem:[#allocation2 + $0x60] sm:$0xff]  ;;  %v53_v61 = vld [vmem:[#allocation2 + $0x68] sm:$0xff]  ;;  %v70_v10 = vld [vmem:[#allocation5 + $0x70] sm:$0xff] }
  0x26   :  { %124 = vadd.xlane.f32.xlu0 %v123_v25  ;;  %v132_v55 = vadd.f32 %v81_v47, %v80_v46  ;;  %v116_v63 = vmul.f32 %v68_v58, %v68_v58  ;;  %v117_v3 = vmul.f32 %v69_v59, %v69_v59  ;;  %v84_v6 = vmul.f32 %v52_v60, %v52_v60  ;;  %v71_v11 = vld [vmem:[#allocation5 + $0x78] sm:$0xff]  ;;  %v54_v15 = vld [vmem:[#allocation2 + $0x70] sm:$0xff] }
  0x27   :  { %v183_v62 = vadd.f32 %v115_v54, %v114_v53  ;;  %v135_v4 = vadd.f32 %v83_v57, %v82_v56  ;;  %v85_v9 = vmul.f32 %v53_v61, %v53_v61  ;;  %v55_v16 = vld [vmem:[#allocation2 + $0x78] sm:$0xff]  ;;  %v118_v21 = vmul.f32 %v70_v10, %v70_v10 }
  0x28   :  { %v186_v17 = vadd.f32 %v117_v3, %v116_v63  ;;  %v119_v22 = vmul.f32 %v71_v11, %v71_v11  ;;  %v86_v24 = vmul.f32 %v54_v15, %v54_v15  ;;  %v87_v25 = vmul.f32 %v55_v16, %v55_v16 }
  0x29   :  { %175 = vadd.xlane.f32.xlu1 %v174_v32  ;;  %v138_v23 = vadd.f32 %v85_v9, %v84_v6  ;;  %v90_v27 = vmul.f32 %v442_v7, %v452_v12  ;;  %v91_v32 = vmul.f32 %v444_v8, %v454_v13  ;;  %v88_v34 = vmul.f32 %v428_v0, %v432_v2 }
  0x2a   :  { %127 = vadd.xlane.f32.xlu0 %v126_v35  ;;  %v189_v26 = vadd.f32 %v119_v22, %v118_v21  ;;  %v141_v33 = vadd.f32 %v87_v25, %v86_v24  ;;  %v89_v35 = vmul.f32 %v430_v1, %v438_v5  ;;  %v94_v37 = vmul.f32 %v476_v28, %v480_v30 }
  0x2b   :  { %v147_v36 = vadd.f32 %v91_v32, %v90_v27  ;;  %v92_v8 = vmul.f32 %v456_v14, %v464_v19  ;;  %v93_v12 = vmul.f32 %v462_v18, %v466_v20  ;;  %v98_v2 = vmul.f32 %v66_v48, %v50_v50 }
  0x2c   :  { %v144_v7 = vadd.f32 %v89_v35, %v88_v34  ;;  %v99_v1 = vmul.f32 %v67_v49, %v51_v51  ;;  %v96_v13 = vmul.f32 %v492_v38, %v496_v40  ;;  %v97_v28 = vmul.f32 %v494_v39, %v498_v41 }
  0x2d   :  { %178 = vadd.xlane.f32.xlu1 %v177_v42  ;;  %v95_v42 = vmul.f32 %v478_v29, %v482_v31  ;;  %v150_v5 = vadd.f32 %v93_v12, %v92_v8  ;;  %v102_v30 = vmul.f32 %v70_v10, %v54_v15  ;;  %v103_v31 = vmul.f32 %v71_v11, %v55_v16 }
  0x2e   :  { %130 = vadd.xlane.f32.xlu0 %v129_v45  ;;  %v159_v29 = vadd.f32 %v99_v1, %v98_v2  ;;  %v156_v14 = vadd.f32 %v97_v28, %v96_v13  ;;  %v100_v19 = vmul.f32 %v68_v58, %v52_v60  ;;  %v101_v18 = vmul.f32 %v69_v59, %v53_v61 }
  0x2f   :  { %v153_v0 = vadd.f32 %v95_v42, %v94_v37  ;;  %v165_v20 = vadd.f32 %v103_v31, %v102_v30  ;;  %v248_v16 = vlaneseq }
  0x30   :  { %v162_v43 = vadd.f32 %v101_v18, %v100_v19 }
  0x31   :  { %181 = vadd.xlane.f32.xlu1 %v180_v52  ;;  %v528_v25 = vshrl.u32 %v248_v16, 7 }
  0x32   :  { %133 = vadd.xlane.f32.xlu0 %v132_v55 }
  0x33   :  { %v250_v35 = vadd.s32 8, %v528_v25  ;;  %v252_v2 = vadd.s32 24, %v528_v25  ;;  %v251_v28 = vadd.s32 16, %v528_v25 }
  0x35   :  { %184 = vadd.xlane.f32.xlu1 %v183_v62 }
  0x36   :  { %136 = vadd.xlane.f32.xlu0 %v135_v4 }
  0x39   :  { %187 = vadd.xlane.f32.xlu1 %v186_v17 }
  0x3a   :  { %139 = vadd.xlane.f32.xlu0 %v138_v23 }
  0x3d   :  { %190 = vadd.xlane.f32.xlu1 %v189_v26 }
  0x3e   :  { %142 = vadd.xlane.f32.xlu0 %v141_v33 }
  0x41   :  { %148 = vadd.xlane.f32.xlu1 %v147_v36  ;;  %v531_v36 = vand.u32 127, %v248_v16 }
  0x42   :  { %145 = vadd.xlane.f32.xlu0 %v144_v7 }
  0x43   :  { %vm260_vm0 = vcmp.eq.s32.totalorder %v250_v35, %v531_v36  ;;  %vm259_vm1 = vcmp.eq.s32.totalorder %v528_v25, %v531_v36  ;;  %vm262_vm3 = vcmp.eq.s32.totalorder %v252_v2, %v531_v36  ;;  %vm261_vm4 = vcmp.eq.s32.totalorder %v251_v28, %v531_v36 }
  0x45   :  { %154 = vadd.xlane.f32.xlu1 %v153_v0 }
  0x46   :  { %151 = vadd.xlane.f32.xlu0 %v150_v5 }
  0x49   :  { %160 = vadd.xlane.f32.xlu1 %v159_v29 }
  0x4a   :  { %157 = vadd.xlane.f32.xlu0 %v156_v14 }
  0x4d   :  { %166 = vadd.xlane.f32.xlu1 %v165_v20 }
  0x4e   :  { %163 = vadd.xlane.f32.xlu0 %v162_v43 }
  0xaa   :  { %v170_v44 = vpop.xlane.xlu1 %169 }
  0xab   :  { %v122_v45 = vpop.xlane.xlu0 %121  ;;  %v200_v48 = vmax.f32 %v170_v44, 1e-24  ;;  %v254_v44 = vadd.s32 40, %v528_v25 }
  0xac   :  { %v192_v49 = vmax.f32 %v122_v45, 1e-24 }
  0xad   :  { %vm264_vm5 = vcmp.eq.s32.totalorder %v254_v44, %v531_v36 }
  0xae   :  { %v173_v38 = vpop.xlane.xlu1 %172  ;;  %v208_v55 = vmul.f32 %v200_v48, %v192_v49 }
  0xaf   :  { %v125_v40 = vpop.xlane.xlu0 %124  ;;  %v201_v41 = vmax.f32 %v173_v38, 1e-24 }
  0xb0   :  { %v193_v47 = vmax.f32 %v125_v40, 1e-24 }
  0xb2   :  { %v176_v46 = vpop.xlane.xlu1 %175  ;;  %v209_v52 = vmul.f32 %v201_v41, %v193_v47 }
  0xb3   :  { %v128_v39 = vpop.xlane.xlu0 %127  ;;  %v202_v56 = vmax.f32 %v176_v46, 1e-24 }
  0xb4   :  { %v194_v57 = vmax.f32 %v128_v39, 1e-24  ;;  %320 = vrsqrt.f32 %v209_v52  ;;  %v253_v39 = vadd.s32 32, %v528_v25 }
  0xb5   :  { %322 = vrsqrt.f32 %v208_v55 }
  0xb6   :  { %v179_v50 = vpop.xlane.xlu1 %178  ;;  %v210_v61 = vmul.f32 %v202_v56, %v194_v57  ;;  %vm263_vm6 = vcmp.eq.s32.totalorder %v253_v39, %v531_v36 }
  0xb7   :  { %v131_v51 = vpop.xlane.xlu0 %130  ;;  %v203_v53 = vmax.f32 %v179_v50, 1e-24 }
  0xb8   :  { %v195_v54 = vmax.f32 %v131_v51, 1e-24 }
  0xba   :  { %v182_v58 = vpop.xlane.xlu1 %181  ;;  %v211_v60 = vmul.f32 %v203_v53, %v195_v54 }
  0xbb   :  { %v134_v59 = vpop.xlane.xlu0 %133  ;;  %v204_v62 = vmax.f32 %v182_v58, 1e-24 }
  0xbc   :  { %v196_v63 = vmax.f32 %v134_v59, 1e-24  ;;  %324 = vrsqrt.f32 %v211_v60 }
  0xbd   :  { %326 = vrsqrt.f32 %v210_v61 }
  0xbe   :  { %v185_v3 = vpop.xlane.xlu1 %184  ;;  %v212_v10 = vmul.f32 %v204_v62, %v196_v63  ;;  %v255_v62 = vadd.s32 48, %v528_v25 }
  0xbf   :  { %v205_v4 = vmax.f32 %v185_v3, 1e-24  ;;  %v137_v6 = vpop.xlane.xlu0 %136 }
  0xc0   :  { %v197_v9 = vmax.f32 %v137_v6, 1e-24  ;;  %vm265_vm7 = vcmp.eq.s32.totalorder %v255_v62, %v531_v36 }
  0xc1   :  { %v321_v33 = vpop.eup %320 }
  0xc2   :  { %v213_v11 = vmul.f32 %v205_v4, %v197_v9  ;;  %v188_v15 = vpop.xlane.xlu1 %187  ;;  %v323_v42 = vpop.eup %322 }
  0xc3   :  { %v206_v17 = vmax.f32 %v188_v15, 1e-24  ;;  %v140_v21 = vpop.xlane.xlu0 %139  ;;  %v256_v15 = vadd.s32 56, %v528_v25 }
  0xc4   :  { %v198_v22 = vmax.f32 %v140_v21, 1e-24  ;;  %328 = vrsqrt.f32 %v213_v11 }
  0xc5   :  { %330 = vrsqrt.f32 %v212_v10  ;;  %vm266_vm8 = vcmp.eq.s32.totalorder %v256_v15, %v531_v36 }
  0xc6   :  { %v214_v23 = vmul.f32 %v206_v17, %v198_v22  ;;  %v191_v24 = vpop.xlane.xlu1 %190 }
  0xc7   :  { %v207_v26 = vmax.f32 %v191_v24, 1e-24  ;;  %v143_v27 = vpop.xlane.xlu0 %142 }
  0xc8   :  { %v199_v32 = vmax.f32 %v143_v27, 1e-24  ;;  %332 = vrsqrt.f32 %v214_v23 }
  0xc9   :  { %v325_v1 = vpop.eup %324 }
  0xca   :  { %v215_v34 = vmul.f32 %v207_v26, %v199_v32  ;;  %v149_v37 = vpop.xlane.xlu1 %148  ;;  %v327_v29 = vpop.eup %326 }
  0xcb   :  { %v225_v7 = vmul.f32 %v321_v33, %v149_v37  ;;  %v146_v8 = vpop.xlane.xlu0 %145 }
  0xcc   :  { %334 = vrsqrt.f32 %v215_v34  ;;  %v224_v12 = vmul.f32 %v323_v42, %v146_v8 }
  0xcd   :  { %v233_v0 = vmul.f32 2.0, %v225_v7 }
  0xce   :  { %v232_v5 = vmul.f32 2.0, %v224_v12  ;;  %v155_v13 = vpop.xlane.xlu1 %154 }
  0xcf   :  { %v241_v30 = vsub.f32 2.0, %v233_v0  ;;  %v227_v31 = vmul.f32 %v325_v1, %v155_v13  ;;  %v152_v14 = vpop.xlane.xlu0 %151 }
  0xd0   :  { %v240_v19 = vsub.f32 2.0, %v232_v5  ;;  %v226_v18 = vmul.f32 %v327_v29, %v152_v14 }
  0xd1   :  { %v268_v20 = vsel %vm260_vm0, %v241_v30, 0.0  ;;  %v235_v43 = vmul.f32 2.0, %v227_v31  ;;  %v329_v45 = vpop.eup %328 }
  0xd2   :  { %v267_v38 = vsel %vm259_vm1, %v240_v19, 0.0  ;;  %v234_v40 = vmul.f32 2.0, %v226_v18  ;;  %v161_v46 = vpop.xlane.xlu1 %160  ;;  %v331_v41 = vpop.eup %330  ;;  %v277_v47 = vsel %vm275_vm2, %v268_v20, 0.0 }
  0xd3   :  { %v276_v48 = vsel %vm275_vm2, %v267_v38, 0.0  ;;  %v243_v49 = vsub.f32 2.0, %v235_v43  ;;  %v229_v50 = vmul.f32 %v329_v45, %v161_v46  ;;  %v158_v51 = vpop.xlane.xlu0 %157 }
  0xd4   :  { %v242_v52 = vsub.f32 2.0, %v234_v40  ;;  %v228_v53 = vmul.f32 %v331_v41, %v158_v51  ;;  %v278_v55 = vadd.f32 %v277_v47, %v276_v48 }
  0xd5   :  { %v237_v54 = vmul.f32 2.0, %v229_v50  ;;  %v270_v56 = vsel %vm262_vm3, %v243_v49, 0.0  ;;  %v333_v59 = vpop.eup %332 }
  0xd6   :  { %v269_v57 = vsel %vm261_vm4, %v242_v52, 0.0  ;;  %v236_v58 = vmul.f32 2.0, %v228_v53  ;;  %v167_v9 = vpop.xlane.xlu1 %166  ;;  %v281_v11 = vsel %vm275_vm2, %v270_v56, 0.0 }
  0xd7   :  { %v279_v60 = vsel %vm275_vm2, %v269_v57, 0.0  ;;  %v245_v61 = vsub.f32 2.0, %v237_v54  ;;  %v164_v63 = vpop.xlane.xlu0 %163 }
  0xd8   :  { %v280_v3 = vadd.f32 %v279_v60, %v278_v55  ;;  %v244_v4 = vsub.f32 2.0, %v236_v58  ;;  %v230_v6 = vmul.f32 %v333_v59, %v164_v63 }
  0xd9   :  { %v335_v10 = vpop.eup %334  ;;  %v272_v16 = vsel %vm264_vm5, %v245_v61, 0.0 }
  0xda   :  { %v282_v17 = vadd.f32 %v281_v11, %v280_v3  ;;  %v271_v21 = vsel %vm263_vm6, %v244_v4, 0.0  ;;  %v238_v22 = vmul.f32 2.0, %v230_v6  ;;  %v231_v24 = vmul.f32 %v335_v10, %v167_v9 }
  0xdb   :  { %v283_v23 = vsel %vm275_vm2, %v271_v21, 0.0  ;;  %v285_v32 = vsel %vm275_vm2, %v272_v16, 0.0 }
  0xdc   :  { %v284_v26 = vadd.f32 %v283_v23, %v282_v17  ;;  %v246_v27 = vsub.f32 2.0, %v238_v22  ;;  %v239_v33 = vmul.f32 2.0, %v231_v24 }
  0xde   :  { %v286_v34 = vadd.f32 %v285_v32, %v284_v26  ;;  %v273_v35 = vsel %vm265_vm7, %v246_v27, 0.0  ;;  %v247_v37 = vsub.f32 2.0, %v239_v33 }
  0xdf   :  { %v287_v25 = vsel %vm275_vm2, %v273_v35, 0.0 }
  0xe0   :  { %v288_v42 = vadd.f32 %v287_v25, %v286_v34  ;;  %v274_v7 = vsel %vm266_vm8, %v247_v37, 0.0 }
  0xe1   :  { %v289_v8 = vsel %vm275_vm2, %v274_v7, 0.0 }
  0xe2   :  { %v290_v12 = vadd.f32 %v289_v8, %v288_v42 }
  0xe4   :  { %v291_v0 = vrot.slane %v290_v12, 4 }
  0xe6   :  { %v292_v2 = vadd.f32 %v291_v0, %v290_v12 }
  0xe8   :  { %v293_v1 = vrot.slane %v292_v2, 2 }
  0xea   :  { %v294_v5 = vadd.f32 %v293_v1, %v292_v2 }
  0xec   :  { %v295_v13 = vrot.slane %v294_v5, 1 }
  0xee   :  { %v296_v28 = vadd.f32 %v295_v13, %v294_v5 }
  0xf0   :  { %298 = vst.msk [vmem:[#allocation7] sm:$0x1] %vm297_vm9, %v296_v28 }
  0xf1   :  { %387 = shalt.err (!%p384_p0)
}
  0xf2   :  { %308 = dma.vmem_to_hbm [thread:$0]  %s306_s1, 16, %s567_s2, [#allocation4]  }
  0xf3   :  { %400 = dma.done.wait [#allocation4], 16  }
  0xf4   :  { %401 = vsyncadd [#allocation4], 4294967280 }
  0xf5   :  { %312 = vsyncpa [#allocation3], 1 }
  0xf6   :  { %313 = vsyncpa [#allocation6], 1 }
  0xf7   :  { %314 = vsyncpa [#allocation4], 1 }

</bundles_post_ra>
